<compile_context>
chip_gen: v5e
topology: v5e:2x2
jax: 0.10.0
libtpu: 0.0.40
codegen_flags: <defaults>
</compile_context>

<pallas_src>
import jax
import jax.numpy as jnp
import numpy as np
from jax.experimental import pallas as pl
from jax.experimental.pallas import tpu as pltpu


def _round_up(x, m):
    return (x + m - 1) // m * m


# ----------------------------------------------------------------------------
# Pallas kernel: one tiled matmul (bias already folded into the weight matrix)
# ----------------------------------------------------------------------------
def _matmul_kernel(a_ref, b_ref, o_ref):
    o_ref[...] = jnp.dot(
        a_ref[...], b_ref[...], preferred_element_type=jnp.float32
    ).astype(o_ref.dtype)


def fused_matmul(a, b, *, tm=256, tn=256):
    """(M, K) @ (K, N) -> (M, N) f32. bf16 operands, f32 MXU accumulation."""
    M, K = a.shape
    K2, N = b.shape
    assert K == K2
    tm = min(tm, _round_up(M, 8))
    tn = min(tn, _round_up(N, 128))
    Mp, Np = _round_up(M, tm), _round_up(N, tn)
    if Mp != M:
        a = jnp.pad(a, ((0, Mp - M), (0, 0)))
    if Np != N:
        b = jnp.pad(b, ((0, 0), (0, Np - N)))
    out = pl.pallas_call(
        _matmul_kernel,
        out_shape=jax.ShapeDtypeStruct((Mp, Np), jnp.float32),
        grid_spec=pltpu.PrefetchScalarGridSpec(
            num_scalar_prefetch=0,
            grid=(Mp // tm, Np // tn),
            in_specs=[
                pl.BlockSpec((tm, K), lambda i, j: (i, 0)),
                pl.BlockSpec((K, tn), lambda i, j: (0, j)),
            ],
            out_specs=pl.BlockSpec((tm, tn), lambda i, j: (i, j)),
        ),
        compiler_params=pltpu.CompilerParams(
            dimension_semantics=("parallel", "parallel")
        ),
    )(a, b)
    if Mp != M or Np != N:
        out = out[:M, :N]
    return out


# ----------------------------------------------------------------------------
# Glue: layout conversion, im2col gather, weight folding
# ----------------------------------------------------------------------------
def dilated_im2col(x_nhwc, d):
    """3x3 conv with dilation=d, padding=d (SAME) -> (N*H*W, 9*C) patches."""
    N, H, W, C = x_nhwc.shape
    xp = jnp.pad(x_nhwc, ((0, 0), (d, d), (d, d), (0, 0)))
    taps = [xp[:, ky * d: ky * d + H, kx * d: kx * d + W, :]
            for ky in range(3) for kx in range(3)]
    cols = jnp.stack(taps, axis=3)              # (N, H, W, 9, C), tap = (ky, kx)
    return cols.reshape(N * H * W, 9 * C)


def conv_w_1x1_to_mat(w):   # (Cout, Cin, 1, 1) -> (Cin, Cout)
    return jnp.transpose(w[:, :, 0, 0], (1, 0))


def conv_w_3x3_to_mat(w):   # (Cout, Cin, 3, 3) -> (9*Cin, Cout), (ky, kx, ci)
    Cout, Cin, _, _ = w.shape
    return jnp.transpose(w, (2, 3, 1, 0)).reshape(9 * Cin, Cout)


def aspp_forward(x_nchw, p):
    """Pallas-backed ASPP forward. x_nchw: (N, Cin, H, W) float32 -> NCHW out."""
    N, Cin, H, W = x_nchw.shape
    Cout = p["b1"].shape[0]
    hp = jax.lax.Precision.HIGHEST

    # --- fold every branch weight through its slice of the final 1x1 conv ----
    wf = conv_w_1x1_to_mat(p["wf"])                      # (5*Cout, Cout)
    wf_b = [wf[i * Cout:(i + 1) * Cout] for i in range(5)]
    w_parts = [
        jnp.dot(conv_w_1x1_to_mat(p["w1"]),   wf_b[0], precision=hp),  # (Cin,  Cout)
        jnp.dot(conv_w_3x3_to_mat(p["w3_1"]), wf_b[1], precision=hp),  # (9Cin, Cout)
        jnp.dot(conv_w_3x3_to_mat(p["w3_2"]), wf_b[2], precision=hp),
        jnp.dot(conv_w_3x3_to_mat(p["w3_3"]), wf_b[3], precision=hp),
        jnp.dot(conv_w_1x1_to_mat(p["wfc"]),  wf_b[4], precision=hp),  # (Cin,  Cout)
    ]
    bias = (jnp.dot(p["b1"],   wf_b[0], precision=hp)
            + jnp.dot(p["b3_1"], wf_b[1], precision=hp)
            + jnp.dot(p["b3_2"], wf_b[2], precision=hp)
            + jnp.dot(p["b3_3"], wf_b[3], precision=hp)
            + jnp.dot(p["bfc"],  wf_b[4], precision=hp)
            + p["bf"])                                    # (Cout,)

    # --- build combined LHS: [x | d6 | d12 | d18 | pooled | ones | 0-pad] ----
    x = jnp.transpose(x_nchw, (0, 2, 3, 1))               # NHWC
    M = N * H * W
    x_flat = x.reshape(M, Cin)
    # TODO(synk): at production ASPP sizes (Cin >= 256) gather the 9 dilated
    # taps inside the kernel (halo'd VMEM tiles) instead of HBM im2col.
    lhs_parts = [x_flat,
                 dilated_im2col(x, 6),
                 dilated_im2col(x, 12),
                 dilated_im2col(x, 18)]
    # global-avg-pool branch: bilinear upsample of a 1x1 map (align_corners=True)
    # is a constant broadcast, so it folds to one per-image row of channel means.
    mean_x = jnp.mean(x, axis=(1, 2))                     # (N, Cin)
    lhs_parts.append(
        jnp.broadcast_to(mean_x[:, None, :], (N, H * W, Cin)).reshape(M, Cin))
    # bias folded in as a constant-ones column (removes a third kernel input).
    lhs_parts.append(jnp.ones((M, 1), x.dtype))

    K = sum(part.shape[1] for part in lhs_parts)           # 29*Cin + 1
    Kp = _round_up(K, 128)                                 # lane-dense contraction
    if Kp != K:
        lhs_parts.append(jnp.zeros((M, Kp - K), x.dtype))

    A = jnp.concatenate(lhs_parts, axis=1).astype(jnp.bfloat16)        # (M, Kp)
    w_rows = w_parts + [bias[None, :]]
    if Kp != K:
        w_rows.append(jnp.zeros((Kp - K, Cout), jnp.float32))
    Wc = jnp.concatenate(w_rows, axis=0).astype(jnp.bfloat16)          # (Kp, Cout)

    out = fused_matmul(A, Wc)                              # (M, Cout) f32
    out = out.reshape(N, H, W, Cout)
    return jnp.transpose(out, (0, 3, 1, 2))                # back to NCHW


# ----------------------------------------------------------------------------
# Pure-JAX reference (mirrors the PyTorch module exactly)
# ----------------------------------------------------------------------------
def aspp_reference(x, p):
    hp = jax.lax.Precision.HIGHEST

    def conv2d(x, w, b, dil=1, pad=0):
        y = jax.lax.conv_general_dilated(
            x, w, window_strides=(1, 1), padding=[(pad, pad), (pad, pad)],
            rhs_dilation=(dil, dil),
            dimension_numbers=("NCHW", "OIHW", "NCHW"), precision=hp)
        return y + b[None, :, None, None]

    c0 = conv2d(x, p["w1"], p["b1"])
    c1 = conv2d(x, p["w3_1"], p["b3_1"], 6, 6)
    c2 = conv2d(x, p["w3_2"], p["b3_2"], 12, 12)
    c3 = conv2d(x, p["w3_3"], p["b3_3"], 18, 18)
    pooled = jnp.mean(x, axis=(2, 3), keepdims=True)
    pooled = conv2d(pooled, p["wfc"], p["bfc"])
    pooled = jnp.broadcast_to(pooled, c0.shape)
    cat = jnp.concatenate([c0, c1, c2, c3, pooled], axis=1)
    return conv2d(cat, p["wf"], p["bf"])


# ----------------------------------------------------------------------------
# Deterministic parameter init (PyTorch Conv2d-style uniform bounds)
# ----------------------------------------------------------------------------
def init_conv(key, cout, cin, kh, kw):
    k1, k2 = jax.random.split(key)
    bound = 1.0 / np.sqrt(cin * kh * kw)
    w = jax.random.uniform(k1, (cout, cin, kh, kw), jnp.float32, -bound, bound)
    b = jax.random.uniform(k2, (cout,), jnp.float32, -bound, bound)
    return w, b


if __name__ == "__main__":
    key = jax.random.PRNGKey(0)
    N, Cin, H, W = 2, 4, 16, 16
    Cout = 256  # module default

    keys = jax.random.split(key, 8)
    params = {}
    params["w1"], params["b1"] = init_conv(keys[0], Cout, Cin, 1, 1)
    params["w3_1"], params["b3_1"] = init_conv(keys[1], Cout, Cin, 3, 3)
    params["w3_2"], params["b3_2"] = init_conv(keys[2], Cout, Cin, 3, 3)
    params["w3_3"], params["b3_3"] = init_conv(keys[3], Cout, Cin, 3, 3)
    params["wfc"], params["bfc"] = init_conv(keys[4], Cout, Cin, 1, 1)
    params["wf"], params["bf"] = init_conv(keys[5], Cout, 5 * Cout, 1, 1)

    x = jax.random.normal(keys[6], (N, Cin, H, W), jnp.float32)

    fwd = jax.jit(aspp_forward)
    out = jax.block_until_ready(fwd(x, params))
    assert out.shape == (N, Cout, H, W), out.shape

    ref = jax.block_until_ready(aspp_reference(x, params))
    np.testing.assert_allclose(np.asarray(out), np.asarray(ref), rtol=1e-2, atol=1e-2)

    print("KERNEL_OK")
</pallas_src>

<mosaic_0001>
module attributes {stable_mosaic.version = 11 : i64} {
  func.func @_matmul_kernel(%arg0: i32, %arg1: i32, %arg2: memref<256x128xbf16, #tpu.memory_space<vmem>>, %arg3: memref<128x256xbf16, #tpu.memory_space<vmem>>, %arg4: memref<256x256xf32, #tpu.memory_space<vmem>>) attributes {dimension_semantics = [#tpu.dimension_semantics<parallel>, #tpu.dimension_semantics<parallel>], iteration_bounds = array<i64: 2, 1>, scalar_prefetch = 0 : i64, scratch_operands = 0 : i64, tpu.core_type = #tpu.core_type<tc>, window_params = [{transform_indices = @transform_0, window_bounds = array<i64: 256, 128>}, {transform_indices = @transform_1, window_bounds = array<i64: 128, 256>}, {transform_indices = @transform_2, window_bounds = array<i64: 256, 256>}]} {
    %c0 = arith.constant 0 : index
    %c0_0 = arith.constant 0 : index
    %0 = vector.load %arg2[%c0, %c0_0] : memref<256x128xbf16, #tpu.memory_space<vmem>>, vector<256x128xbf16>
    %c0_1 = arith.constant 0 : index
    %c0_2 = arith.constant 0 : index
    %1 = vector.load %arg3[%c0_1, %c0_2] : memref<128x256xbf16, #tpu.memory_space<vmem>>, vector<128x256xbf16>
    %cst = arith.constant dense<0.000000e+00> : vector<256x256xf32>
    %2 = tpu.matmul %0, %1, %cst {dimension_numbers = #tpu.dot_dimension_numbers<[1], [0], [0], [1], [0, 0, 1, 1], [], []>} : vector<256x128xbf16>, vector<128x256xbf16>, vector<256x256xf32> -> vector<256x256xf32>
    %c0_3 = arith.constant 0 : index
    %c0_4 = arith.constant 0 : index
    %3 = vector.load %arg4[%c0_3, %c0_4] : memref<256x256xf32, #tpu.memory_space<vmem>>, vector<256x256xf32>
    tpu.vector_store %arg4[%c0_3, %c0_4], %2 {strides = array<i32>} : memref<256x256xf32, #tpu.memory_space<vmem>>, vector<256x256xf32>,
    return
  }
  func.func @transform_0(%arg0: i32, %arg1: i32) -> (i32, i32) {
    %c0_i32 = arith.constant 0 : i32
    %c0_i32_0 = arith.constant 0 : i32
    return %arg0, %c0_i32 : i32, i32
  }
  func.func @transform_1(%arg0: i32, %arg1: i32) -> (i32, i32) {
    %c0_i32 = arith.constant 0 : i32
    %c0_i32_0 = arith.constant 0 : i32
    return %c0_i32, %arg1 : i32, i32
  }
  func.func @transform_2(%arg0: i32, %arg1: i32) -> (i32, i32) {
    %c0_i32 = arith.constant 0 : i32
    return %arg0, %arg1 : i32, i32
  }
}

</mosaic_0001>

<bundles_post_ra>
// kernel: aspp_forward.1
= control target key start
LH: loop header
LB: loop body
LE: loop exit
PB: predicated region body
PF: predicated region fallthrough
CT: control target
= control target key end

     0   :  { %7 = vsyncpa [#allocation3], 0  ;;  %s1383_s0 = inlined_call_operand.vmem [shape: bf16[512,128], index: 0, kind: input, shape index: {}]   ;;  %s1384_s1 = inlined_call_operand.vmem [shape: bf16[128,256], index: 1, kind: input, shape index: {}]   ;;  %s1385_s2 = inlined_call_operand.hbm [shape: f32[512,256], index: 2, kind: output, shape index: {}]  }
   0x1   :  { %9 = vsyncpa [#allocation3 + $0x1], 0  ;;  %s1102_s9 = smov 0   ;;  %s1104_s10 = smov 0  }
   0x2   :  { %s1106_s11 = smov 0   ;;  %s1108_s12 = smov 0  }
   0x3   :  { %s1110_s13 = smov 0   ;;  %s1112_s14 = smov 0  }
   0x4 LB: > { %s755_s15 = sadd.s32 4294967295, %s1083_s14   ;;  %s756_s16 = sadd.s32 4294967294, %s1083_s14   ;;  %s1083_s14 = sphi %s1112_s14, %s15_s14   ;;  %s1079_s13 = sphi %s1110_s13, %s1392_s13   ;;  %s1075_s12 = sphi %s1108_s12, %s1391_s12   ;;  %s1071_s11 = sphi %s1106_s11, %s1390_s11   ;;  %s1067_s10 = sphi %s1104_s10, %s1389_s10   ;;  %s1063_s9 = sphi %s1102_s9, %s1388_s9  }
   0x5   : > { %s27_s17 = sadd.s32 1, %s1079_s13  ;;  %s88_s18 = sadd.s32 1, %s1071_s11 }
   0x6   : > { %p29_p0 = scmp.ge.s32.totalorder %s27_s17, 2  ;;  %p98_p1 = scmp.ne.s32.totalorder %s1071_s11, %s1067_s10 }
   0x7   : > { %p99_p2 = scmp.eq.s32.totalorder %s755_s15, 1  ;;  %p104_p3 = scmp.ne.s32.totalorder %s1067_s10, %s1063_s9 }
   0x8   : > { %s1394_s17 = smov (%p29_p0, %s27_s17), 0  ;;  %p105_p5 = scmp.eq.s32.totalorder %s756_s16, 1 }
   0x9   : > { %p1142_p4 = por %p99_p2, %p98_p1  ;;  %s83_s20 = ssub.s32 %s1079_s13, %s1394_s17 }
   0xa   : > { %p760_p6 = scmp.ge.s32.totalorder %s1083_s14, 1  ;;  %p86_p7 = scmp.eq.s32.totalorder %s83_s20, 0 }
   0xb   : > { %p1149_p8 = por %p105_p5, %p104_p3  ;;  %p141_p9 = scmp.lt.s32.totalorder %s1083_s14, 3 }
   0xc   : > { %s1155_s22 = scalar_select %p86_p7, %s1071_s11, %s88_s18  }
   0xd   : > { %p142_p10 = pnand %p760_p6, %p141_p9 }
   0xe   : > { %s762_s27 = sshll.u32 (!%p142_p10), %s1075_s12, 5  ;;  %s931_s23 = sshll.u32 (!%p142_p10), %s1075_s12, 9 }
   0xf   : > { %145 = sbr.rel (%p142_p10) target bundleno = 311 (0x137), region = 28  ;;  %p169_p11 = scmp.lt.s32.totalorder (!%p142_p10), %s762_s27, 63 }
  0x10   : > { %s663_s26 = scalar_lea.hbm (!%p142_p10), %s1385_s2, %s931_s23  ;;  %s1025_s6 = scalar_lea.hbm (!%p142_p10), %s1385_s2, 1024 }
  0x11   : > { %s666_s29 = sshll.u32 (!%p142_p10), %s663_s26, 4  ;;  %s667_s29 = int_to_ptr.hbm [resolvable:$true] %s666_s29 }
  0x12   : > { %s1019_s30 = sshra.s32 (!%p142_p10), %s667_s29, 4  ;;  %s1020_s30 = int_to_ptr.hbm [resolvable:$true] %s1019_s30 }
  0x13   : > { %p1026_p1 = scmp.lt.s32.totalorder (!%p142_p10), %s1020_s30, %s1385_s2 }
  0x14   : > { %v886_v0 = vld [vmem:[%s1384_s1 + $0x70] sm:$0xf]  ;;  %v929_v1 = vld [vmem:[%s1384_s1 + $0x74] sm:$0xf0]  ;;  %v928_v2 = vld [vmem:[%s1384_s1 + $0x74] sm:$0xf] }
  0x15   : > { %v887_v3 = vor.u32 %v929_v1, %v886_v0  ;;  %v888_v4 = vld [vmem:[%s1384_s1 + $0x78] sm:$0xf0]  ;;  %v878_v5 = vld [vmem:[%s1384_s1 + $0x60] sm:$0xf]  ;;  %v927_v6 = vld [vmem:[%s1384_s1 + $0x64] sm:$0xf0] }
  0x16   : > { %v891_v7 = vor.u32 %v928_v2, %v888_v4  ;;  %v926_v8 = vld [vmem:[%s1384_s1 + $0x64] sm:$0xf]  ;;  %v880_v9 = vld [vmem:[%s1384_s1 + $0x68] sm:$0xf0]  ;;  %v879_v10 = vor.u32 %v927_v6, %v878_v5  ;;  %v870_v12 = vld [vmem:[%s1384_s1 + $0x50] sm:$0xf] }
  0x17   : > { %406 = vmatpush.bf16.msra.mxu0 %v887_v3  ;;  %932 = vmatpush.bf16.msra.mxu2 %v887_v3  ;;  %v883_v11 = vor.u32 %v926_v8, %v880_v9  ;;  %v925_v13 = vld [vmem:[%s1384_s1 + $0x54] sm:$0xf0]  ;;  %v924_v14 = vld [vmem:[%s1384_s1 + $0x54] sm:$0xf]  ;;  %v872_v15 = vld [vmem:[%s1384_s1 + $0x58] sm:$0xf0] }
  0x18   : > { %495 = vmatpush.bf16.msra.mxu1 %v891_v7  ;;  %940 = vmatpush.bf16.msra.mxu3 %v891_v7  ;;  %v871_v16 = vor.u32 %v925_v13, %v870_v12  ;;  %v875_v17 = vor.u32 %v924_v14, %v872_v15  ;;  %v862_v18 = vld [vmem:[%s1384_s1 + $0x40] sm:$0xf]  ;;  %v923_v19 = vld [vmem:[%s1384_s1 + $0x44] sm:$0xf0]  ;;  %v922_v20 = vld [vmem:[%s1384_s1 + $0x44] sm:$0xf] }
  0x19   : > { %v864_v21 = vld [vmem:[%s1384_s1 + $0x48] sm:$0xf0]  ;;  %v863_v22 = vor.u32 %v923_v19, %v862_v18  ;;  %v854_v24 = vld [vmem:[%s1384_s1 + $0x30] sm:$0xf]  ;;  %v921_v25 = vld [vmem:[%s1384_s1 + $0x34] sm:$0xf0] }
  0x1a   : > { %v867_v23 = vor.u32 %v922_v20, %v864_v21  ;;  %v920_v26 = vld [vmem:[%s1384_s1 + $0x34] sm:$0xf]  ;;  %v856_v27 = vld [vmem:[%s1384_s1 + $0x38] sm:$0xf0]  ;;  %v855_v28 = vor.u32 %v921_v25, %v854_v24  ;;  %v846_v30 = vld [vmem:[%s1384_s1 + $0x20] sm:$0xf] }
  0x1b   : > { %407 = vmatpush.bf16.msra.mxu0 %v879_v10  ;;  %933 = vmatpush.bf16.msra.mxu2 %v879_v10  ;;  %v859_v29 = vor.u32 %v920_v26, %v856_v27  ;;  %v919_v31 = vld [vmem:[%s1384_s1 + $0x24] sm:$0xf0]  ;;  %v918_v32 = vld [vmem:[%s1384_s1 + $0x24] sm:$0xf]  ;;  %v848_v33 = vld [vmem:[%s1384_s1 + $0x28] sm:$0xf0] }
  0x1c   : > { %496 = vmatpush.bf16.msra.mxu1 %v883_v11  ;;  %941 = vmatpush.bf16.msra.mxu3 %v883_v11  ;;  %v847_v34 = vor.u32 %v919_v31, %v846_v30  ;;  %v851_v35 = vor.u32 %v918_v32, %v848_v33  ;;  %v838_v36 = vld [vmem:[%s1384_s1 + $0x10] sm:$0xf]  ;;  %v917_v37 = vld [vmem:[%s1384_s1 + $0x14] sm:$0xf0]  ;;  %s1396_s27 = smov (!%p169_p11, %s762_s27), 63 }
  0x1d   : > { %v916_v38 = vld [vmem:[%s1384_s1 + $0x14] sm:$0xf]  ;;  %v840_v39 = vld [vmem:[%s1384_s1 + $0x18] sm:$0xf0]  ;;  %v839_v40 = vor.u32 %v917_v37, %v838_v36  ;;  %v830_v42 = vld [vmem:[%s1384_s1] sm:$0xf] }
  0x1e   : > { %v843_v41 = vor.u32 %v916_v38, %v840_v39  ;;  %v915_v43 = vld [vmem:[%s1384_s1 + $0x4] sm:$0xf0]  ;;  %s763_s3 = sshll.u32 %s1396_s27, 2  ;;  %v914_v44 = vld [vmem:[%s1384_s1 + $0x4] sm:$0xf]  ;;  %s165_s27 = sand.u32 1, %s1067_s10  }
  0x1f   : > { %408 = vmatpush.bf16.msra.mxu0 %v871_v16  ;;  %934 = vmatpush.bf16.msra.mxu2 %v871_v16  ;;  %v832_v45 = vld [vmem:[%s1384_s1 + $0x8] sm:$0xf0]  ;;  %v831_v46 = vor.u32 %v915_v43, %v830_v42  ;;  %s1257_s16 = scalar_lea.vmem %s1383_s0, %s763_s3  ;;  %s761_s18 = sshll.u32 %s165_s27, 9 }
  0x20   : > { %497 = vmatpush.bf16.msra.mxu1 %v875_v17  ;;  %942 = vmatpush.bf16.msra.mxu3 %v875_v17  ;;  %v835_v47 = vor.u32 %v914_v44, %v832_v45  ;;  %v898_v48 = vld [vmem:[%s1257_s16] sm:$0xff]  ;;  %v899_v50 = vld [vmem:[%s1257_s16 + $0x8] sm:$0xff]  ;;  %v900_v52 = vld [vmem:[%s1257_s16 + $0x10] sm:$0xff]  ;;  %s1278_s20 = scalar_lea.vmem [#allocation2], %s761_s18  ;;  %s649_s12 = scalar_lea.sflag [#allocation3], %s165_s27 }
  0x21   : > { %v906_v49 = vld [vmem:[%s1257_s16 + $0x40] sm:$0xff]  ;;  %v907_v51 = vld [vmem:[%s1257_s16 + $0x48] sm:$0xff]  ;;  %v908_v53 = vld [vmem:[%s1257_s16 + $0x50] sm:$0xff]  ;;  %s664_s28 = sshll.u32 %s1278_s20, 4  ;;  %s1021_s3 = scalar_lea.hbm %s1020_s30, 512  ;;  %s665_s28 = int_to_ptr.vmem [resolvable:$true] %s664_s28 }
  0x22   : > { %v901_v54 = vld [vmem:[%s1257_s16 + $0x18] sm:$0xff]  ;;  %v902_v56 = vld [vmem:[%s1257_s16 + $0x20] sm:$0xff]  ;;  %v903_v58 = vld [vmem:[%s1257_s16 + $0x28] sm:$0xff]  ;;  %p1022_p12 = scmp.ne.s32.totalorder %s1020_s30, %s1021_s3  ;;  %p1027_p2 = scmp.lt.s32.totalorder %s1025_s6, %s1021_s3 }
  0x23   : > { %409 = vmatpush.bf16.msra.mxu0 %v863_v22  ;;  %935 = vmatpush.bf16.msra.mxu2 %v863_v22  ;;  %v909_v55 = vld [vmem:[%s1257_s16 + $0x58] sm:$0xff]  ;;  %v910_v57 = vld [vmem:[%s1257_s16 + $0x60] sm:$0xff]  ;;  %v911_v59 = vld [vmem:[%s1257_s16 + $0x68] sm:$0xff] }
  0x24   : > { %498 = vmatpush.bf16.msra.mxu1 %v867_v23  ;;  %943 = vmatpush.bf16.msra.mxu3 %v867_v23  ;;  %v904_v60 = vld [vmem:[%s1257_s16 + $0x30] sm:$0xff]  ;;  %v905_v62 = vld [vmem:[%s1257_s16 + $0x38] sm:$0xff]  ;;  %p1023_p13 = pnand %p1022_p12, %p1142_p4  ;;  %p1028_p3 = por %p1027_p2, %p1026_p1 }
  0x25   : > { %v912_v61 = vld [vmem:[%s1257_s16 + $0x70] sm:$0xff]  ;;  %v913_v63 = vld [vmem:[%s1257_s16 + $0x78] sm:$0xff] }
  0x26   : > { %p1024_p0 = pneg %p1023_p13 }
  0x27   : > { %410 = vmatpush.bf16.msra.mxu0 %v855_v28  ;;  %936 = vmatpush.bf16.msra.mxu2 %v855_v28 }
  0x28   : > { %499 = vmatpush.bf16.msra.mxu1 %v859_v29  ;;  %944 = vmatpush.bf16.msra.mxu3 %v859_v29  ;;  %p1029_p5 = pnand %p1028_p3, %p1024_p0 }
  0x2b   : > { %411 = vmatpush.bf16.msra.mxu0 %v847_v34  ;;  %937 = vmatpush.bf16.msra.mxu2 %v847_v34 }
  0x2c   : > { %500 = vmatpush.bf16.msra.mxu1 %v851_v35  ;;  %945 = vmatpush.bf16.msra.mxu3 %v851_v35 }
  0x2f   : > { %412 = vmatpush.bf16.msra.mxu0 %v839_v40  ;;  %938 = vmatpush.bf16.msra.mxu2 %v839_v40 }
  0x30   : > { %501 = vmatpush.bf16.msra.mxu1 %v843_v41  ;;  %946 = vmatpush.bf16.msra.mxu3 %v843_v41 }
  0x33   : > { %413 = vmatpush.bf16.msra.mxu0 %v831_v46  ;;  %939 = vmatpush.bf16.msra.mxu2 %v831_v46 }
  0x34   : > { %502 = vmatpush.bf16.msra.mxu1 %v835_v47  ;;  %947 = vmatpush.bf16.msra.mxu3 %v835_v47 }
  0x36   : > { %414 = vmatmul.bf16.vlgmr.msra.gmra.mxu0 %v898_v48  ;;  %454 = vmatmul.bf16.vlgmr.msra.gmra.mxu2 %v906_v49 }
  0x37   : > { %503 = vmatmul.bf16.vlgmr.msra.gmra.mxu1 %v898_v48  ;;  %543 = vmatmul.bf16.vlgmr.msra.gmra.mxu3 %v906_v49 }
  0x46   : > { %419 = vmatmul.bf16.gmra.mxu0 %v899_v50  ;;  %459 = vmatmul.bf16.gmra.mxu2 %v907_v51 }
  0x47   : > { %508 = vmatmul.bf16.gmra.mxu1 %v899_v50  ;;  %548 = vmatmul.bf16.gmra.mxu3 %v907_v51 }
  0x56   : > { %424 = vmatmul.bf16.gmra.mxu0 %v900_v52  ;;  %464 = vmatmul.bf16.gmra.mxu2 %v908_v53 }
  0x57   : > { %513 = vmatmul.bf16.gmra.mxu1 %v900_v52  ;;  %553 = vmatmul.bf16.gmra.mxu3 %v908_v53 }
  0x66   : > { %429 = vmatmul.bf16.gmra.mxu0 %v901_v54  ;;  %469 = vmatmul.bf16.gmra.mxu2 %v909_v55 }
  0x67   : > { %518 = vmatmul.bf16.gmra.mxu1 %v901_v54  ;;  %558 = vmatmul.bf16.gmra.mxu3 %v909_v55 }
  0x76   : > { %434 = vmatmul.bf16.gmra.mxu0 %v902_v56  ;;  %474 = vmatmul.bf16.gmra.mxu2 %v910_v57 }
  0x77   : > { %523 = vmatmul.bf16.gmra.mxu1 %v902_v56  ;;  %563 = vmatmul.bf16.gmra.mxu3 %v910_v57 }
  0x86   : > { %439 = vmatmul.bf16.gmra.mxu0 %v903_v58  ;;  %479 = vmatmul.bf16.gmra.mxu2 %v911_v59 }
  0x87   : > { %528 = vmatmul.bf16.gmra.mxu1 %v903_v58  ;;  %568 = vmatmul.bf16.gmra.mxu3 %v911_v59 }
  0x96   : > { %444 = vmatmul.bf16.gmra.mxu0 %v904_v60  ;;  %484 = vmatmul.bf16.gmra.mxu2 %v912_v61 }
  0x97   : > { %533 = vmatmul.bf16.gmra.mxu1 %v904_v60  ;;  %573 = vmatmul.bf16.gmra.mxu3 %v912_v61 }
  0xa6   : > { %449 = vmatmul.bf16.gmra.mxu0 %v905_v62  ;;  %489 = vmatmul.bf16.gmra.mxu2 %v913_v63 }
  0xa7   : > { %538 = vmatmul.bf16.gmra.mxu1 %v905_v62  ;;  %578 = vmatmul.bf16.gmra.mxu3 %v913_v63 }
  0xb3   : > { %v415_v0 = vpop.f32.mrf.mxu0 }
  0xb4   : > { %584 = vst [vmem:[%s1278_s20] sm:$0xff] %v415_v0  ;;  %v504_v1 = vpop.f32.mrf.mxu1 }
  0xb5   : > { %585 = vst [vmem:[%s1278_s20 + $0x8] sm:$0xff] %v504_v1 }
  0xb9   : > { %v455_v2 = vpop.f32.mrf.mxu2 }
  0xba   : > { %616 = vst [vmem:[%s1278_s20 + $0x100] sm:$0xff] %v455_v2  ;;  %v544_v3 = vpop.f32.mrf.mxu3 }
  0xbb   : > { %617 = vst [vmem:[%s1278_s20 + $0x108] sm:$0xff] %v544_v3  ;;  %v417_v4 = vpop.f32.mrf.mxu0 }
  0xbc   : > { %586 = vst [vmem:[%s1278_s20 + $0x10] sm:$0xff] %v417_v4  ;;  %v506_v5 = vpop.f32.mrf.mxu1 }
  0xbd   : > { %587 = vst [vmem:[%s1278_s20 + $0x18] sm:$0xff] %v506_v5 }
  0xc1   : > { %v457_v6 = vpop.f32.mrf.mxu2 }
  0xc2   : > { %618 = vst [vmem:[%s1278_s20 + $0x110] sm:$0xff] %v457_v6  ;;  %v546_v7 = vpop.f32.mrf.mxu3 }
  0xc3   : > { %619 = vst [vmem:[%s1278_s20 + $0x118] sm:$0xff] %v546_v7  ;;  %v420_v8 = vpop.f32.mrf.mxu0 }
  0xc4   : > { %588 = vst [vmem:[%s1278_s20 + $0x20] sm:$0xff] %v420_v8  ;;  %v509_v9 = vpop.f32.mrf.mxu1 }
  0xc5   : > { %589 = vst [vmem:[%s1278_s20 + $0x28] sm:$0xff] %v509_v9 }
  0xc9   : > { %v460_v10 = vpop.f32.mrf.mxu2 }
  0xca   : > { %620 = vst [vmem:[%s1278_s20 + $0x120] sm:$0xff] %v460_v10  ;;  %v549_v11 = vpop.f32.mrf.mxu3 }
  0xcb   : > { %621 = vst [vmem:[%s1278_s20 + $0x128] sm:$0xff] %v549_v11  ;;  %v422_v12 = vpop.f32.mrf.mxu0 }
  0xcc   : > { %590 = vst [vmem:[%s1278_s20 + $0x30] sm:$0xff] %v422_v12  ;;  %v511_v13 = vpop.f32.mrf.mxu1 }
  0xcd   : > { %591 = vst [vmem:[%s1278_s20 + $0x38] sm:$0xff] %v511_v13 }
  0xd1   : > { %v462_v14 = vpop.f32.mrf.mxu2 }
  0xd2   : > { %622 = vst [vmem:[%s1278_s20 + $0x130] sm:$0xff] %v462_v14  ;;  %v551_v15 = vpop.f32.mrf.mxu3 }
  0xd3   : > { %623 = vst [vmem:[%s1278_s20 + $0x138] sm:$0xff] %v551_v15  ;;  %v425_v16 = vpop.f32.mrf.mxu0 }
  0xd4   : > { %592 = vst [vmem:[%s1278_s20 + $0x40] sm:$0xff] %v425_v16  ;;  %v514_v17 = vpop.f32.mrf.mxu1 }
  0xd5   : > { %593 = vst [vmem:[%s1278_s20 + $0x48] sm:$0xff] %v514_v17 }
  0xd9   : > { %v465_v18 = vpop.f32.mrf.mxu2 }
  0xda   : > { %624 = vst [vmem:[%s1278_s20 + $0x140] sm:$0xff] %v465_v18  ;;  %v554_v19 = vpop.f32.mrf.mxu3 }
  0xdb   : > { %625 = vst [vmem:[%s1278_s20 + $0x148] sm:$0xff] %v554_v19  ;;  %v427_v20 = vpop.f32.mrf.mxu0 }
  0xdc   : > { %594 = vst [vmem:[%s1278_s20 + $0x50] sm:$0xff] %v427_v20  ;;  %v516_v21 = vpop.f32.mrf.mxu1 }
  0xdd   : > { %595 = vst [vmem:[%s1278_s20 + $0x58] sm:$0xff] %v516_v21 }
  0xe1   : > { %v467_v22 = vpop.f32.mrf.mxu2 }
  0xe2   : > { %626 = vst [vmem:[%s1278_s20 + $0x150] sm:$0xff] %v467_v22  ;;  %v556_v23 = vpop.f32.mrf.mxu3 }
  0xe3   : > { %627 = vst [vmem:[%s1278_s20 + $0x158] sm:$0xff] %v556_v23  ;;  %v430_v24 = vpop.f32.mrf.mxu0 }
  0xe4   : > { %596 = vst [vmem:[%s1278_s20 + $0x60] sm:$0xff] %v430_v24  ;;  %v519_v25 = vpop.f32.mrf.mxu1 }
  0xe5   : > { %597 = vst [vmem:[%s1278_s20 + $0x68] sm:$0xff] %v519_v25 }
  0xe9   : > { %v470_v26 = vpop.f32.mrf.mxu2 }
  0xea   : > { %628 = vst [vmem:[%s1278_s20 + $0x160] sm:$0xff] %v470_v26  ;;  %v559_v27 = vpop.f32.mrf.mxu3 }
  0xeb   : > { %629 = vst [vmem:[%s1278_s20 + $0x168] sm:$0xff] %v559_v27  ;;  %v432_v28 = vpop.f32.mrf.mxu0 }
  0xec   : > { %598 = vst [vmem:[%s1278_s20 + $0x70] sm:$0xff] %v432_v28  ;;  %v521_v29 = vpop.f32.mrf.mxu1 }
  0xed   : > { %599 = vst [vmem:[%s1278_s20 + $0x78] sm:$0xff] %v521_v29 }
  0xf1   : > { %v472_v30 = vpop.f32.mrf.mxu2 }
  0xf2   : > { %630 = vst [vmem:[%s1278_s20 + $0x170] sm:$0xff] %v472_v30  ;;  %v561_v31 = vpop.f32.mrf.mxu3 }
  0xf3   : > { %631 = vst [vmem:[%s1278_s20 + $0x178] sm:$0xff] %v561_v31  ;;  %v435_v32 = vpop.f32.mrf.mxu0 }
  0xf4   : > { %600 = vst [vmem:[%s1278_s20 + $0x80] sm:$0xff] %v435_v32  ;;  %v524_v33 = vpop.f32.mrf.mxu1 }
  0xf5   : > { %601 = vst [vmem:[%s1278_s20 + $0x88] sm:$0xff] %v524_v33 }
  0xf9   : > { %v475_v34 = vpop.f32.mrf.mxu2 }
  0xfa   : > { %632 = vst [vmem:[%s1278_s20 + $0x180] sm:$0xff] %v475_v34  ;;  %v564_v35 = vpop.f32.mrf.mxu3 }
  0xfb   : > { %633 = vst [vmem:[%s1278_s20 + $0x188] sm:$0xff] %v564_v35  ;;  %v437_v36 = vpop.f32.mrf.mxu0 }
  0xfc   : > { %602 = vst [vmem:[%s1278_s20 + $0x90] sm:$0xff] %v437_v36  ;;  %v526_v37 = vpop.f32.mrf.mxu1 }
  0xfd   : > { %603 = vst [vmem:[%s1278_s20 + $0x98] sm:$0xff] %v526_v37 }
 0x101   : > { %v477_v38 = vpop.f32.mrf.mxu2 }
 0x102   : > { %634 = vst [vmem:[%s1278_s20 + $0x190] sm:$0xff] %v477_v38  ;;  %v566_v39 = vpop.f32.mrf.mxu3 }
 0x103   : > { %635 = vst [vmem:[%s1278_s20 + $0x198] sm:$0xff] %v566_v39  ;;  %v440_v40 = vpop.f32.mrf.mxu0 }
 0x104   : > { %604 = vst [vmem:[%s1278_s20 + $0xa0] sm:$0xff] %v440_v40  ;;  %v529_v41 = vpop.f32.mrf.mxu1 }
 0x105   : > { %605 = vst [vmem:[%s1278_s20 + $0xa8] sm:$0xff] %v529_v41 }
 0x109   : > { %v480_v42 = vpop.f32.mrf.mxu2 }
 0x10a   : > { %636 = vst [vmem:[%s1278_s20 + $0x1a0] sm:$0xff] %v480_v42  ;;  %v569_v43 = vpop.f32.mrf.mxu3 }
 0x10b   : > { %637 = vst [vmem:[%s1278_s20 + $0x1a8] sm:$0xff] %v569_v43  ;;  %v442_v44 = vpop.f32.mrf.mxu0 }
 0x10c   : > { %606 = vst [vmem:[%s1278_s20 + $0xb0] sm:$0xff] %v442_v44  ;;  %v531_v45 = vpop.f32.mrf.mxu1 }
 0x10d   : > { %607 = vst [vmem:[%s1278_s20 + $0xb8] sm:$0xff] %v531_v45 }
 0x111   : > { %v482_v46 = vpop.f32.mrf.mxu2 }
 0x112   : > { %638 = vst [vmem:[%s1278_s20 + $0x1b0] sm:$0xff] %v482_v46  ;;  %v571_v47 = vpop.f32.mrf.mxu3 }
 0x113   : > { %639 = vst [vmem:[%s1278_s20 + $0x1b8] sm:$0xff] %v571_v47  ;;  %v445_v48 = vpop.f32.mrf.mxu0 }
 0x114   : > { %608 = vst [vmem:[%s1278_s20 + $0xc0] sm:$0xff] %v445_v48  ;;  %v534_v49 = vpop.f32.mrf.mxu1 }
 0x115   : > { %609 = vst [vmem:[%s1278_s20 + $0xc8] sm:$0xff] %v534_v49 }
 0x119   : > { %v485_v50 = vpop.f32.mrf.mxu2 }
 0x11a   : > { %640 = vst [vmem:[%s1278_s20 + $0x1c0] sm:$0xff] %v485_v50  ;;  %v574_v51 = vpop.f32.mrf.mxu3 }
 0x11b   : > { %641 = vst [vmem:[%s1278_s20 + $0x1c8] sm:$0xff] %v574_v51  ;;  %v447_v52 = vpop.f32.mrf.mxu0 }
 0x11c   : > { %610 = vst [vmem:[%s1278_s20 + $0xd0] sm:$0xff] %v447_v52  ;;  %v536_v53 = vpop.f32.mrf.mxu1 }
 0x11d   : > { %611 = vst [vmem:[%s1278_s20 + $0xd8] sm:$0xff] %v536_v53 }
 0x121   : > { %v487_v54 = vpop.f32.mrf.mxu2 }
 0x122   : > { %642 = vst [vmem:[%s1278_s20 + $0x1d0] sm:$0xff] %v487_v54  ;;  %v576_v55 = vpop.f32.mrf.mxu3 }
 0x123   : > { %643 = vst [vmem:[%s1278_s20 + $0x1d8] sm:$0xff] %v576_v55  ;;  %v450_v56 = vpop.f32.mrf.mxu0 }
 0x124   : > { %612 = vst [vmem:[%s1278_s20 + $0xe0] sm:$0xff] %v450_v56  ;;  %v539_v57 = vpop.f32.mrf.mxu1 }
 0x125   : > { %613 = vst [vmem:[%s1278_s20 + $0xe8] sm:$0xff] %v539_v57 }
 0x129   : > { %v490_v58 = vpop.f32.mrf.mxu2 }
 0x12a   : > { %644 = vst [vmem:[%s1278_s20 + $0x1e0] sm:$0xff] %v490_v58  ;;  %v579_v59 = vpop.f32.mrf.mxu3 }
 0x12b   : > { %645 = vst [vmem:[%s1278_s20 + $0x1e8] sm:$0xff] %v579_v59  ;;  %v452_v60 = vpop.f32.mrf.mxu0 }
 0x12c   : > { %614 = vst [vmem:[%s1278_s20 + $0xf0] sm:$0xff] %v452_v60  ;;  %v541_v61 = vpop.f32.mrf.mxu1 }
 0x12d   : > { %615 = vst [vmem:[%s1278_s20 + $0xf8] sm:$0xff] %v541_v61 }
 0x131   : > { %v492_v62 = vpop.f32.mrf.mxu2 }
 0x132   : > { %646 = vst [vmem:[%s1278_s20 + $0x1f0] sm:$0xff] %v492_v62  ;;  %v581_v63 = vpop.f32.mrf.mxu3 }
 0x133   : > { %647 = vst [vmem:[%s1278_s20 + $0x1f8] sm:$0xff] %v581_v63 }
 0x134   : > { %1032 = shalt.err (!%p1029_p5)
}
 0x135   : > { %s1085_s15 = smov 256   ;;  %s1086_s16 = smov 16  }
 0x136   : > { %948 = dma.vmem_to_hbm [thread:$0]  (%p1142_p4), %s665_s28, 8192, %s667_s29, %s649_s12, %s1085_s15, %s1085_s15, %s1086_s16  }
 0x137 PF: > { %p954_p6 = scmp.ge.s32.totalorder %s1083_s14, 2  ;;  %s681_s27 = sand.u32 1, %s1063_s9  }
 0x138   : > { %s682_s18 = scalar_lea.sflag [#allocation3], %s681_s27 }
 0x139   : > { %p951_p7 = pnand %p954_p6, %p1149_p8 }
 0x13b   : > { %p952_p9 = pneg %p951_p7 }
 0x13d   : > { %1058 = dma.done.wait (%p952_p9), %s682_s18, 8192  }
 0x13e   : > { %1060 = vsyncadd (%p952_p9), %s682_s18, 4294959104  ;;  %s15_s14 = sadd.s32 1, %s1083_s14   ;;  %s1388_s9 = smov %s1067_s10 }
 0x13f   : > { %p12_p10 = scmp.ge.s32.totalorder %s15_s14, 4   ;;  %s1389_s10 = smov %s1071_s11 }
 0x140   : > { %s1390_s11 = smov %s1155_s22  ;;  %s1391_s12 = smov %s1079_s13 }
 0x141   : > { %s1392_s13 = smov %s1394_s17  ;;  %14 = sbr.rel (!%p12_p10) target bundleno = 4 (0x4), region = 66 }
 0x146   :  { %688 = vsyncpa [#allocation3], 1 }
 0x147   :  { %690 = vsyncpa [#allocation3 + $0x1], 1 }

</bundles_post_ra>
